<compile_context>
chip_gen: v7x
topology: tpu7x:2x2x1
jax: 0.10.0
libtpu: 0.0.40
codegen_flags: <defaults>
</compile_context>

<pallas_src>
import functools

import jax
import jax.numpy as jnp
from jax.experimental import pallas as pl
from jax.experimental.pallas import tpu as pltpu

BN_EPS = 1e-5
_LANE = 128
_SUBLANE = 8
_MAX_BLOCK_INPUT_BYTES = 8 << 20     # per-step DMA block sweet spot (4-8 MiB)
_TWO_PASS_MIN_ROWS = 4096            # switch to N-tiled path when the fused
                                     # grid would collapse to a single step


def _round_up(a, b):
    return (a + b - 1) // b * b


def _round_down(a, b):
    return (a // b) * b


def _vmem_capacity_bytes():
    """Generation-aware VMEM capacity (v7x: 64 MiB, v5e/v6e: 128 MiB)."""
    try:
        info = pltpu.get_tpu_info()
        cap = int(getattr(info, "vmem_capacity_bytes", 0))
        if cap > 0:
            return cap
    except Exception:
        pass
    return 64 << 20  # most conservative current generation (v7x per-core)


# ----------------------------------------------------------------------------
# Fused one-pass kernel: stats + normalize for one feature tile (full batch
# resident in VMEM).  Single f32 sweep for sum / sumsq, single FMA write-out.
# ----------------------------------------------------------------------------
def _bn_fused_kernel(x_ref, g_ref, b_ref, o_ref, *, eps, n_rows):
    x = x_ref[...].astype(jnp.float32)                       # (N, td)
    inv_n = 1.0 / n_rows
    mean = jnp.sum(x, axis=0, keepdims=True) * inv_n          # (1, td)
    mean_sq = jnp.sum(x * x, axis=0, keepdims=True) * inv_n
    # E[x^2] - mean^2 (biased variance); clamp guards fp cancellation.
    var = jnp.maximum(mean_sq - mean * mean, 0.0)
    inv_std = jax.lax.rsqrt(var + eps)                        # EUP rsqrt
    scale = g_ref[...] * inv_std                              # (1, td)
    shift = b_ref[...] - mean * scale
    o_ref[...] = (x * scale + shift).astype(o_ref.dtype)      # one FMA pass


# ----------------------------------------------------------------------------
# Two-pass path, pass 1: per-feature sum / sum-of-squares reduced over batch
# tiles (accumulated directly in the resident f32 output blocks).
# ----------------------------------------------------------------------------
def _bn_stats_kernel(x_ref, sum_ref, sq_ref, *, n_rows, tile_n, mask_rows):
    k = pl.program_id(1)

    @pl.when(k == 0)
    def _init():
        sum_ref[...] = jnp.zeros_like(sum_ref)
        sq_ref[...] = jnp.zeros_like(sq_ref)

    x = x_ref[...].astype(jnp.float32)
    if mask_rows:
        # Zero padded rows of the ragged last batch tile so they do not
        # pollute the column sums (padded columns are harmless: per-column).
        row = jax.lax.broadcasted_iota(jnp.int32, x.shape, 0) + k * tile_n
        x = jnp.where(row < n_rows, x, 0.0)
    sum_ref[...] += jnp.sum(x, axis=0, keepdims=True)
    sq_ref[...] += jnp.sum(x * x, axis=0, keepdims=True)


# ----------------------------------------------------------------------------
# Two-pass path, pass 2: fully parallel streaming y = x * scale + shift.
# ----------------------------------------------------------------------------
def _bn_apply_kernel(x_ref, scale_ref, shift_ref, o_ref):
    x = x_ref[...].astype(jnp.float32)
    o_ref[...] = (x * scale_ref[...] + shift_ref[...]).astype(o_ref.dtype)


# ----------------------------------------------------------------------------
# Wrapper: LinearBatchNorm.forward (training-mode batch statistics)
# ----------------------------------------------------------------------------
def linear_batch_norm(x, gamma=None, beta=None, *, eps=BN_EPS, force_path=None):
    """LinearBatchNorm forward.  x: (..., dim) -> same shape / dtype."""
    orig_shape = x.shape
    dim = orig_shape[-1]
    x2 = x.reshape(-1, dim)              # mirrors x.view(-1, dim, 1, 1); no copy
    n, d = x2.shape
    isz = x2.dtype.itemsize

    if gamma is None:
        gamma = jnp.ones((d,), jnp.float32)   # affine=True default init
    if beta is None:
        beta = jnp.zeros((d,), jnp.float32)
    g2 = gamma.reshape(1, d).astype(jnp.float32)
    b2 = beta.reshape(1, d).astype(jnp.float32)

    # ---- generation-aware VMEM accounting ---------------------------------
    vmem_cap = _vmem_capacity_bytes()
    # Real pipelined footprint per block element: 2x double-buffered input +
    # 2x double-buffered output + ~3 f32 in-kernel temporaries.
    bytes_per_elem = 4 * isz + 12
    footprint_budget = min((vmem_cap * 3) // 4, 96 << 20)   # 48 MiB on v7x

    min_tile_d = d if d <= _LANE else _LANE
    fused_fits = n * min_tile_d * bytes_per_elem <= footprint_budget
    fused_single_step = d <= _LANE

    if force_path is None:
        use_two_pass = (not fused_fits) or (
            fused_single_step and n >= _TWO_PASS_MIN_ROWS)
    else:
        use_two_pass = force_path == "two_pass"

    # ======================= fused one-pass path ===========================
    if not use_two_pass:
        if d <= _LANE:
            tile_d = d                       # single full-width block
        else:
            d_groups = pl.cdiv(d, _LANE)
            max_by_budget = footprint_budget // (n * _LANE * bytes_per_elem)
            max_by_block = _MAX_BLOCK_INPUT_BYTES // (n * _LANE * isz)
            max_by_grid = max(1, d_groups // 2)   # keep >=2 steps (megacore)
            t = max(1, min(d_groups, max_by_budget, max_by_block, max_by_grid))
            tile_d = int(t) * _LANE
        grid_d = pl.cdiv(d, tile_d)
        footprint = n * tile_d * bytes_per_elem
        vmem_limit = int(min(vmem_cap, max(32 << 20, footprint + (8 << 20))))

        out = pl.pallas_call(
            functools.partial(_bn_fused_kernel, eps=eps, n_rows=n),
            out_shape=jax.ShapeDtypeStruct((n, d), x2.dtype),
            grid=(grid_d,),
            in_specs=[
                pl.BlockSpec((n, tile_d), lambda j: (0, j)),   # full batch, D-tiled
                pl.BlockSpec((1, tile_d), lambda j: (0, j)),   # gamma tile
                pl.BlockSpec((1, tile_d), lambda j: (0, j)),   # beta tile
            ],
            out_specs=pl.BlockSpec((n, tile_d), lambda j: (0, j)),
            compiler_params=pltpu.CompilerParams(
                dimension_semantics=("parallel",),
                vmem_limit_bytes=vmem_limit),
            cost_estimate=pl.CostEstimate(
                flops=7 * n * d, transcendentals=d,
                bytes_accessed=2 * n * d * isz),
        )(x2, g2, b2)
        return out.reshape(orig_shape)

    # ===================== two-pass N-tiled path ============================
    if d <= _LANE:
        tile_d = d
    else:
        tile_d = min(512, _round_down(d, _LANE))
    grid_d = pl.cdiv(d, tile_d)

    # Batch tile: multiple of 8, sized from the corrected footprint budget,
    # capped so the per-step block stays multi-MiB and the N grid has enough
    # steps to pipeline / split across TensorCores.
    max_by_budget = max(1, footprint_budget // (tile_d * bytes_per_elem))
    max_by_block = max(1, _MAX_BLOCK_INPUT_BYTES // (tile_d * isz))
    max_by_steps = _round_up(pl.cdiv(n, 8), _SUBLANE)
    tile_n = min(max_by_budget, max_by_block, max_by_steps, _round_up(n, _SUBLANE))
    tile_n = max(_SUBLANE, _round_down(tile_n, _SUBLANE))
    grid_n = pl.cdiv(n, tile_n)

    footprint = tile_n * tile_d * bytes_per_elem
    vmem_limit = int(min(vmem_cap, max(32 << 20, footprint + (8 << 20))))

    # Pass 1: per-feature sum / sumsq, reduction axis (batch tiles) last.
    sums, sqs = pl.pallas_call(
        functools.partial(_bn_stats_kernel, n_rows=n, tile_n=tile_n,
                          mask_rows=(n % tile_n) != 0),
        out_shape=(jax.ShapeDtypeStruct((1, d), jnp.float32),
                   jax.ShapeDtypeStruct((1, d), jnp.float32)),
        grid=(grid_d, grid_n),
        in_specs=[pl.BlockSpec((tile_n, tile_d), lambda j, k: (k, j))],
        out_specs=(pl.BlockSpec((1, tile_d), lambda j, k: (0, j)),
                   pl.BlockSpec((1, tile_d), lambda j, k: (0, j))),
        compiler_params=pltpu.CompilerParams(
            dimension_semantics=("parallel", "arbitrary"),
            vmem_limit_bytes=vmem_limit),
        cost_estimate=pl.CostEstimate(
            flops=3 * n * d, transcendentals=0, bytes_accessed=n * d * isz),
    )(x2)

    # Tiny (1, d) math outside the kernel: fold stats + affine into scale/shift.
    inv_n = 1.0 / n
    mean = sums * inv_n
    var = jnp.maximum(sqs * inv_n - mean * mean, 0.0)
    inv_std = jax.lax.rsqrt(var + eps)
    scale = g2 * inv_std
    shift = b2 - mean * scale

    # Pass 2: streaming normalize, fully parallel over (N, D) tiles.
    out = pl.pallas_call(
        _bn_apply_kernel,
        out_shape=jax.ShapeDtypeStruct((n, d), x2.dtype),
        grid=(grid_n, grid_d),
        in_specs=[
            pl.BlockSpec((tile_n, tile_d), lambda i, j: (i, j)),
            pl.BlockSpec((1, tile_d), lambda i, j: (0, j)),
            pl.BlockSpec((1, tile_d), lambda i, j: (0, j)),
        ],
        out_specs=pl.BlockSpec((tile_n, tile_d), lambda i, j: (i, j)),
        compiler_params=pltpu.CompilerParams(
            dimension_semantics=("parallel", "parallel"),
            vmem_limit_bytes=vmem_limit),
        cost_estimate=pl.CostEstimate(
            flops=2 * n * d, transcendentals=0, bytes_accessed=2 * n * d * isz),
    )(x2, scale, shift)
    return out.reshape(orig_shape)


# ----------------------------------------------------------------------------
if __name__ == "__main__":
    key = jax.random.PRNGKey(0)
    k1, k2, k3 = jax.random.split(key, 3)

    def ref_bn(xv, eps=BN_EPS):
        x32 = xv.astype(jnp.float32)
        mean = jnp.mean(x32, axis=0, keepdims=True)
        var = jnp.mean((x32 - mean) ** 2, axis=0, keepdims=True)
        return ((x32 - mean) / jnp.sqrt(var + eps)).astype(xv.dtype)

    # 1) typical small PiCO head: fused single-tile path
    x1 = jax.random.normal(k1, (8, 32), jnp.float32)
    y1 = jax.block_until_ready(linear_batch_norm(x1))
    r1 = ref_bn(x1)
    assert y1.shape == x1.shape and y1.dtype == x1.dtype
    assert bool(jnp.all(jnp.isfinite(y1)))
    assert bool(jnp.allclose(y1, r1, atol=1e-5, rtol=1e-5)), \
        float(jnp.max(jnp.abs(y1 - r1)))

    # 2) ragged feature dim (>1 lane group): fused path, 2 feature tiles,
    #    masked edge tile, no whole-array pad/slice.
    x2 = jax.random.normal(k2, (32, 200), jnp.float32) * 2.0 + 0.5
    y2 = jax.block_until_ready(linear_batch_norm(x2))
    r2 = ref_bn(x2)
    assert bool(jnp.all(jnp.isfinite(y2)))
    assert bool(jnp.allclose(y2, r2, atol=1e-4, rtol=1e-4)), \
        float(jnp.max(jnp.abs(y2 - r2)))

    # 3) two-pass N-tiled path (forced, small shapes): stats + apply kernels,
    #    ragged batch and feature edges.
    x3 = jax.random.normal(k3, (200, 160), jnp.float32) - 1.5
    y3 = jax.block_until_ready(linear_batch_norm(x3, force_path="two_pass"))
    r3 = ref_bn(x3)
    assert bool(jnp.all(jnp.isfinite(y3)))
    assert bool(jnp.allclose(y3, r3, atol=1e-4, rtol=1e-4)), \
        float(jnp.max(jnp.abs(y3 - r3)))

    print("KERNEL_OK")
</pallas_src>

<mosaic_0001>
module attributes {stable_mosaic.version = 11 : i64} {
  func.func @_bn_fused_kernel(%arg0: i32, %arg1: memref<8x32xf32, #tpu.memory_space<vmem>>, %arg2: memref<1x32xf32, #tpu.memory_space<vmem>>, %arg3: memref<1x32xf32, #tpu.memory_space<vmem>>, %arg4: memref<8x32xf32, #tpu.memory_space<vmem>>) attributes {dimension_semantics = [#tpu.dimension_semantics<parallel>], iteration_bounds = array<i64: 1>, scalar_prefetch = 0 : i64, scratch_operands = 0 : i64, tpu.core_type = #tpu.core_type<tc>, window_params = [{transform_indices = @transform_0, window_bounds = array<i64: 8, 32>}, {transform_indices = @transform_1, window_bounds = array<i64: 1, 32>}, {transform_indices = @transform_2, window_bounds = array<i64: 1, 32>}, {transform_indices = @transform_3, window_bounds = array<i64: 8, 32>}]} {
    %c0 = arith.constant 0 : index
    %c0_0 = arith.constant 0 : index
    %0 = vector.load %arg1[%c0, %c0_0] : memref<8x32xf32, #tpu.memory_space<vmem>>, vector<8x32xf32>
    %cst = arith.constant dense<0.000000e+00> : vector<32xf32>
    %1 = vector.multi_reduction <add>, %0, %cst [0] : vector<8x32xf32> to vector<32xf32>
    %2 = vector.shape_cast %1 : vector<32xf32> to vector<1x32xf32>
    %cst_1 = arith.constant 1.250000e-01 : f32
    %3 = vector.broadcast %cst_1 : f32 to vector<1x32xf32>
    %4 = arith.mulf %2, %3 : vector<1x32xf32>
    %5 = arith.mulf %0, %0 : vector<8x32xf32>
    %cst_2 = arith.constant dense<0.000000e+00> : vector<32xf32>
    %6 = vector.multi_reduction <add>, %5, %cst_2 [0] : vector<8x32xf32> to vector<32xf32>
    %7 = vector.shape_cast %6 : vector<32xf32> to vector<1x32xf32>
    %cst_3 = arith.constant 1.250000e-01 : f32
    %8 = vector.broadcast %cst_3 : f32 to vector<1x32xf32>
    %9 = arith.mulf %7, %8 : vector<1x32xf32>
    %10 = arith.mulf %4, %4 : vector<1x32xf32>
    %11 = arith.subf %9, %10 : vector<1x32xf32>
    %cst_4 = arith.constant 0.000000e+00 : f32
    %12 = vector.broadcast %cst_4 : f32 to vector<1x32xf32>
    %13 = arith.maximumf %11, %12 : vector<1x32xf32>
    %cst_5 = arith.constant 9.99999974E-6 : f32
    %14 = vector.broadcast %cst_5 : f32 to vector<1x32xf32>
    %15 = arith.addf %13, %14 : vector<1x32xf32>
    %16 = math.rsqrt %15 : vector<1x32xf32>
    %c0_6 = arith.constant 0 : index
    %c0_7 = arith.constant 0 : index
    %17 = vector.load %arg2[%c0_6, %c0_7] : memref<1x32xf32, #tpu.memory_space<vmem>>, vector<1x32xf32>
    %18 = arith.mulf %17, %16 : vector<1x32xf32>
    %c0_8 = arith.constant 0 : index
    %c0_9 = arith.constant 0 : index
    %19 = vector.load %arg3[%c0_8, %c0_9] : memref<1x32xf32, #tpu.memory_space<vmem>>, vector<1x32xf32>
    %20 = arith.mulf %4, %18 : vector<1x32xf32>
    %21 = arith.subf %19, %20 : vector<1x32xf32>
    %22 = vector.broadcast %18 : vector<1x32xf32> to vector<8x32xf32>
    %23 = arith.mulf %0, %22 : vector<8x32xf32>
    %24 = vector.broadcast %21 : vector<1x32xf32> to vector<8x32xf32>
    %25 = arith.addf %23, %24 : vector<8x32xf32>
    %c0_10 = arith.constant 0 : index
    %c0_11 = arith.constant 0 : index
    %26 = vector.load %arg4[%c0_10, %c0_11] : memref<8x32xf32, #tpu.memory_space<vmem>>, vector<8x32xf32>
    tpu.vector_store %arg4[%c0_10, %c0_11], %25 {strides = array<i32>} : memref<8x32xf32, #tpu.memory_space<vmem>>, vector<8x32xf32>,
    return
  }
  func.func @transform_0(%arg0: i32) -> (i32, i32) {
    %c0_i32 = arith.constant 0 : i32
    %c0_i32_0 = arith.constant 0 : i32
    return %c0_i32, %arg0 : i32, i32
  }
  func.func @transform_1(%arg0: i32) -> (i32, i32) {
    %c0_i32 = arith.constant 0 : i32
    %c0_i32_0 = arith.constant 0 : i32
    return %c0_i32, %arg0 : i32, i32
  }
  func.func @transform_2(%arg0: i32) -> (i32, i32) {
    %c0_i32 = arith.constant 0 : i32
    %c0_i32_0 = arith.constant 0 : i32
    return %c0_i32, %arg0 : i32, i32
  }
  func.func @transform_3(%arg0: i32) -> (i32, i32) {
    %c0_i32 = arith.constant 0 : i32
    %c0_i32_0 = arith.constant 0 : i32
    return %c0_i32, %arg0 : i32, i32
  }
}

</mosaic_0001>

<bundles_post_ra>
// kernel: tpu_custom_call.1
= control target key start
LH: loop header
LB: loop body
LE: loop exit
PB: predicated region body
PF: predicated region fallthrough
CT: control target
= control target key end

     0   :  { %8 = vsyncpa [#allocation3], 0  ;;  %s193_s0 = inlined_call_operand.hbm [shape: f32[8,32], index: 0, kind: input, shape index: {}]   ;;  %s194_s1 = inlined_call_operand.vmem [shape: f32[1,32], index: 1, kind: input, shape index: {}]   ;;  %s195_s2 = inlined_call_operand.vmem [shape: f32[1,32], index: 2, kind: input, shape index: {}]   ;;  %s196_s3 = inlined_call_operand.hbm [shape: f32[8,32], index: 3, kind: output, shape index: {}]  }
   0x1   :  { %9 = vsyncpa [#allocation4], 0  ;;  %s138_s12 = smov [#allocation2]   ;;  %s90_s16 = scalar_lea.hbm %s193_s0, 128 }
   0x2   :  { %s16_s13 = sshll.u32 %s138_s12, 4  ;;  %p91_p0 = scmp.ne.s32.totalorder %s193_s0, %s90_s16  ;;  %s17_s13 = int_to_ptr.vmem [resolvable:$true] %s16_s13 }
   0x3   :  { %p94_p1 = scmp.lt.u32.totalorder %s90_s16, %s193_s0 }
   0x5   :  { %p96_p2 = pnand %p94_p1, %p91_p0 }
   0x7   :  { %99 = shalt.err (!%p96_p2)
}
   0x8   :  { %s100_s21 = scalar_lea.vmem %s17_s13, 128  ;;  %p105_p4 = scmp.lt.s32.totalorder %s17_s13, %s17_s13 }
   0x9   :  { %p101_p3 = scmp.ne.s32.totalorder %s17_s13, %s100_s21  ;;  %p106_p5 = scmp.lt.s32.totalorder %s100_s21, %s100_s21 }
   0xb   :  { %p107_p6 = por %p106_p5, %p105_p4 }
   0xd   :  { %p108_p7 = pnand %p107_p6, %p101_p3 }
   0xf   :  { %111 = shalt.err (!%p108_p7)
}
  0x10   :  { %19 = dma.hbm_to_vmem [thread:$0]  %s193_s0, 128, %s17_s13, [#allocation3]  }
  0x11   :  { %134 = dma.done.wait [#allocation3], 128  }
  0x12   :  { %135 = vsyncadd [#allocation3], 4294967168  ;;  %vm28_vm0 = vcmask 261120   ;;  %v27_v0 = vld [vmem:[#allocation2] sm:$0xff]  ;;  %v57_v22 = vlaneseq  ;;  %s139_s27 = smov [#allocation5]  }
  0x13   :  { %v29_v1 = vsel %vm28_vm0, %v27_v0, 0.0  ;;  %v37_v2 = vmul.f32 %v27_v0, %v27_v0  ;;  %v51_v24 = vld [vmem:[%s194_s1] sm:$0x1]  ;;  %s77_s28 = sshll.u32 %s139_s27, 4  ;;  %s78_s28 = int_to_ptr.vmem [resolvable:$true] %s77_s28 }
  0x14   :  { %v30_v3 = vrot.slane %v29_v1, 4  ;;  %v58_v23 = vshrl.u32 %v57_v22, 7  ;;  %v53_v28 = vld [vmem:[%s195_s2] sm:$0x1]  ;;  %s112_s29 = scalar_lea.vmem %s78_s28, 128  ;;  %p117_p9 = scmp.lt.s32.totalorder %s78_s28, %s78_s28 }
  0x15   :  { %v38_v4 = vsel %vm28_vm0, %v37_v2, 0.0  ;;  %p113_p8 = scmp.ne.s32.totalorder %s78_s28, %s112_s29  ;;  %p118_p10 = scmp.lt.s32.totalorder %s112_s29, %s112_s29 }
  0x16   :  { %v31_v5 = vadd.f32 %v30_v3, %v29_v1  ;;  %v39_v6 = vrot.slane %v38_v4, 4  ;;  %v59_v25 = vsub.s32 0, %v58_v23 }
  0x17   :  { %p119_p11 = por %p118_p10, %p117_p9 }
  0x18   :  { %v32_v7 = vrot.slane %v31_v5, 2  ;;  %v40_v8 = vadd.f32 %v39_v6, %v38_v4 }
  0x19   :  { %p120_p12 = pnand %p119_p11, %p113_p8 }
  0x1a   :  { %v33_v9 = vadd.f32 %v32_v7, %v31_v5  ;;  %v41_v10 = vrot.slane %v40_v8, 2 }
  0x1c   :  { %v34_v11 = vrot.slane %v33_v9, 1  ;;  %v42_v12 = vadd.f32 %v41_v10, %v40_v8 }
  0x1e   :  { %v35_v13 = vadd.f32 %v34_v11, %v33_v9  ;;  %v43_v14 = vrot.slane %v42_v12, 1 }
  0x20   :  { %v36_v15 = vmul.f32 0.125, %v35_v13  ;;  %v44_v16 = vadd.f32 %v43_v14, %v42_v12 }
  0x22   :  { %v45_v17 = vmul.f32 0.125, %v44_v16  ;;  %v46_v18 = vmul.f32 %v36_v15, %v36_v15 }
  0x24   :  { %v47_v19 = vsub.f32 %v45_v17, %v46_v18 }
  0x26   :  { %v48_v20 = vmax.f32 %v47_v19, 0.0 }
  0x28   :  { %v49_v21 = vadd.f32 1e-05, %v48_v20 }
  0x2a   :  { %88 = vrsqrt.f32 %v49_v21 }
  0x34   :  { %v89_v26 = vpop.eup %88 }
  0x35   :  { %v52_v27 = vmul.f32 %v89_v26, %v51_v24 }
  0x37   :  { %v54_v29 = vmul.f32 %v52_v27, %v36_v15  ;;  %v60_v30 = vrot.slane %v52_v27, %v59_v25 }
  0x39   :  { %v55_v31 = vsub.f32 %v53_v28, %v54_v29  ;;  %v62_v32 = vmul.f32 %v60_v30, %v27_v0 }
  0x3b   :  { %v67_v33 = vrot.slane %v55_v31, %v59_v25 }
  0x3d   :  { %v69_v34 = vadd.f32 %v67_v33, %v62_v32 }
  0x3f   :  { %70 = vst.msk [vmem:[#allocation5] sm:$0xff] %vm28_vm0, %v69_v34 }
  0x40   :  { %123 = shalt.err (!%p120_p12)
}
  0x41   :  { %s124_s30 = scalar_lea.hbm %s196_s3, 128 }
  0x42   :  { %p125_p13 = scmp.ne.s32.totalorder %s196_s3, %s124_s30  ;;  %p128_p0 = scmp.lt.u32.totalorder %s124_s30, %s196_s3 }
  0x44   :  { %p130_p1 = pnand %p128_p0, %p125_p13 }
  0x46   :  { %133 = shalt.err (!%p130_p1)
}
  0x47   :  { %80 = dma.vmem_to_hbm [thread:$0]  %s78_s28, 128, %s196_s3, [#allocation4]  }
  0x48   :  { %136 = dma.done.wait [#allocation4], 128  }
  0x49   :  { %137 = vsyncadd [#allocation4], 4294967168 }
  0x4a   :  { %84 = vsyncpa [#allocation3], 1 }
  0x4b   :  { %85 = vsyncpa [#allocation4], 1 }

</bundles_post_ra>
